<compile_context>
chip_gen: v7x
topology: tpu7x:2x2x1
jax: 0.10.0
libtpu: 0.0.40
codegen_flags: <defaults>
</compile_context>

<pallas_src>
import functools

import jax
import jax.numpy as jnp
from jax.experimental import pallas as pl
from jax.experimental.pallas import tpu as pltpu


def _sigmoid(x):
    # Explicit formula keeps kernel and pure-JAX reference numerically identical.
    # (pl.reciprocal(..., approx=True) would offload the divide to the EUP at the
    #  cost of a ~1e-4 relative error.)
    return 1.0 / (1.0 + jnp.exp(-x))


def _round_up(x, m):
    return (x + m - 1) // m * m


def _mosaic_params(dims, needed_bytes):
    # Raise the scoped VMEM limit above v5e's 16 MiB default, with headroom, but
    # stay under v7x's 64 MiB physical VMEM.
    limit = int(min(64 * 2**20, max(32 * 2**20, 2 * needed_bytes + (2 << 20))))
    return pltpu.CompilerParams(dimension_semantics=dims,
                                vmem_limit_bytes=limit)


# ---------------------------------------------------------------------------
# LayerNorm kernel: rows = flattened (time * batch), feature axis reduced in f32
# ---------------------------------------------------------------------------
def _layernorm_kernel(x_ref, g_ref, b_ref, o_ref, *, eps):
    x = x_ref[...].astype(jnp.float32)                       # (rows_t, I)
    mu = jnp.mean(x, axis=-1, keepdims=True)
    xc = x - mu
    var = jnp.mean(xc * xc, axis=-1, keepdims=True)
    y = xc * jax.lax.rsqrt(var + eps)
    o_ref[...] = (y * g_ref[...] + b_ref[...]).astype(o_ref.dtype)


def layer_norm(x_tbi, gamma, beta, *, eps=1e-5, rows_tile=512):
    """x_tbi: (T, B, I) time-major. Normalizes over the feature axis."""
    T, B, I = x_tbi.shape
    rows = T * B
    x2 = x_tbi.reshape(rows, I)
    rt = rows if rows <= rows_tile else _round_up(min(rows_tile, rows), 8)
    g = gamma.reshape(1, I).astype(jnp.float32)
    b = beta.reshape(1, I).astype(jnp.float32)
    needed = 4 * rt * I * x2.dtype.itemsize + 4 * I * 4
    out = pl.pallas_call(
        functools.partial(_layernorm_kernel, eps=eps),
        out_shape=jax.ShapeDtypeStruct((rows, I), x_tbi.dtype),
        grid_spec=pltpu.PrefetchScalarGridSpec(
            num_scalar_prefetch=0,
            grid=(pl.cdiv(rows, rt),),
            in_specs=[
                pl.BlockSpec((rt, I), lambda r: (r, 0)),
                pl.BlockSpec((1, I), lambda r: (0, 0)),
                pl.BlockSpec((1, I), lambda r: (0, 0)),
            ],
            out_specs=pl.BlockSpec((rt, I), lambda r: (r, 0)),
        ),
        compiler_params=_mosaic_params(("parallel",), needed),
    )(x2, g, b)
    return out.reshape(T, B, I)


# ---------------------------------------------------------------------------
# GRU layer: grid = time blocks ("arbitrary" = true recurrence).
#   * gi for the whole block is one hoisted MXU matmul into VMEM scratch.
#   * hidden state carried in a f32 VMEM scratch across grid steps.
#   * backward direction handled purely through reversed index_maps.
# ---------------------------------------------------------------------------
def _gru_block_kernel(x_ref, h0_ref, wi_ref, wh_ref, bi_ref, bhh_ref,
                      out_ref, hlast_ref, h_carry, gi_scr,
                      *, hidden, bp, block_t, reverse):
    g = pl.program_id(0)

    @pl.when(g == 0)
    def _():
        h_carry[...] = h0_ref[...].astype(jnp.float32)

    H = hidden
    mxu_dtype = wi_ref.dtype

    # Hoisted input projection for the whole time block (b_ih folded in here,
    # so only b_hh is added on the serial path).
    gi_scr[...] = (
        jnp.dot(x_ref[...], wi_ref[...], preferred_element_type=jnp.float32)
        + bi_ref[...])                                        # (block_t*Bp, 3H) f32

    wh = wh_ref[...]                                          # resident (H, 3H)
    bhh = bhh_ref[...]                                        # (1, 3H) f32

    def step(s, h):
        # Local time index within the block; reversed recurrence for the
        # backward direction (blocks themselves are reversed by the index_map).
        li = (block_t - 1 - s) if reverse else s
        row = pl.multiple_of(li * bp, bp)
        gi = gi_scr[pl.ds(row, bp), :]                        # (Bp, 3H) f32
        gh = jnp.dot(h.astype(mxu_dtype), wh,
                     preferred_element_type=jnp.float32) + bhh
        # PyTorch GRU gate order: [reset, update, new]; b_hn stays inside r*( ).
        r = _sigmoid(gi[:, 0:H] + gh[:, 0:H])
        z = _sigmoid(gi[:, H:2 * H] + gh[:, H:2 * H])
        n = jnp.tanh(gi[:, 2 * H:3 * H] + r * gh[:, 2 * H:3 * H])
        h_new = (1.0 - z) * n + z * h
        out_ref[pl.ds(row, bp), :] = h_new.astype(out_ref.dtype)
        return h_new

    h_fin = jax.lax.fori_loop(0, block_t, step, h_carry[...], unroll=True)
    h_carry[...] = h_fin
    hlast_ref[...] = h_fin        # resident output block: final value survives


def gru_layer(x_tbi, h0, w_ih, w_hh, b_ih, b_hh, *, reverse=False,
              mxu_dtype=jnp.bfloat16, block_t=32):
    """x_tbi: (T, B, I) time-major; h0: (B, H); w_ih: (3H, I); w_hh: (3H, H).

    Returns (out (T, B, H) in x dtype, forward time order; h_last (B, H))."""
    T, B, I = x_tbi.shape
    H = w_hh.shape[1]
    out_dtype = x_tbi.dtype

    # Time-block size that divides T exactly (every block is full).
    bt = min(block_t, T)
    while T % bt:
        bt -= 1
    nb = T // bt

    # Pad batch to a sublane multiple so row blocks are (8, .)-aligned and the
    # (T, Bp, I) -> (T*Bp, I) flattening is layout-free.
    Bp = max(8, _round_up(B, 8))
    if Bp != B:
        x_tbi = jnp.pad(x_tbi, ((0, 0), (0, Bp - B), (0, 0)))
        h0 = jnp.pad(h0, ((0, Bp - B), (0, 0)))

    x2 = x_tbi.reshape(T * Bp, I).astype(mxu_dtype)
    h0 = h0.astype(jnp.float32)
    wi = jnp.transpose(w_ih).astype(mxu_dtype)                # (I, 3H)
    wh = jnp.transpose(w_hh).astype(mxu_dtype)                # (H, 3H)
    bi = b_ih.reshape(1, 3 * H).astype(jnp.float32)
    bhh = b_hh.reshape(1, 3 * H).astype(jnp.float32)

    if reverse:
        blk_map = lambda g: (nb - 1 - g, 0)     # read/write blocks back-to-front
    else:
        blk_map = lambda g: (g, 0)

    mxu_sz = jnp.dtype(mxu_dtype).itemsize
    needed = (2 * bt * Bp * I * mxu_sz                        # x block (dbl-buf)
              + 2 * bt * Bp * H * jnp.dtype(out_dtype).itemsize   # out block
              + 2 * (I + H) * 3 * H * mxu_sz                  # resident weights
              + bt * Bp * 3 * H * 4                           # gi scratch
              + 6 * Bp * H * 4 + 4 * 3 * H * 4)               # h0/hlast/carry/biases

    out2, h_last = pl.pallas_call(
        functools.partial(_gru_block_kernel, hidden=H, bp=Bp, block_t=bt,
                          reverse=reverse),
        out_shape=(jax.ShapeDtypeStruct((T * Bp, H), out_dtype),
                   jax.ShapeDtypeStruct((Bp, H), jnp.float32)),
        grid_spec=pltpu.PrefetchScalarGridSpec(
            num_scalar_prefetch=0,
            grid=(nb,),
            in_specs=[
                pl.BlockSpec((bt * Bp, I), blk_map),          # streamed x block
                pl.BlockSpec((Bp, H), lambda g: (0, 0)),      # h0 (resident)
                pl.BlockSpec((I, 3 * H), lambda g: (0, 0)),   # W_ih^T (resident)
                pl.BlockSpec((H, 3 * H), lambda g: (0, 0)),   # W_hh^T (resident)
                pl.BlockSpec((1, 3 * H), lambda g: (0, 0)),   # b_ih
                pl.BlockSpec((1, 3 * H), lambda g: (0, 0)),   # b_hh
            ],
            out_specs=[
                pl.BlockSpec((bt * Bp, H), blk_map),          # out block
                pl.BlockSpec((Bp, H), lambda g: (0, 0)),      # h_last (resident)
            ],
            scratch_shapes=[
                pltpu.VMEM((Bp, H), jnp.float32),             # hidden carry (f32)
                pltpu.VMEM((bt * Bp, 3 * H), jnp.float32),    # hoisted gi block
            ],
        ),
        compiler_params=_mosaic_params(("arbitrary",), needed),  # true recurrence
    )(x2, h0, wi, wh, bi, bhh)

    out_tbh = out2.reshape(T, Bp, H)[:, :B, :]
    return out_tbh, h_last[:B].astype(out_dtype)


# ---------------------------------------------------------------------------
# Pure-JAX references (same numeric policy knob, for correctness checking)
# ---------------------------------------------------------------------------
def _layer_norm_ref(x, gamma, beta, eps=1e-5):
    mu = jnp.mean(x, axis=-1, keepdims=True)
    xc = x - mu
    var = jnp.mean(xc * xc, axis=-1, keepdims=True)
    return xc * jax.lax.rsqrt(var + eps) * gamma + beta


def _gru_layer_ref(x_tbi, h0, w_ih, w_hh, b_ih, b_hh, *, reverse=False,
                   mxu_dtype=jnp.bfloat16, block_t=None):
    del block_t
    H = w_hh.shape[1]
    wi = jnp.transpose(w_ih).astype(mxu_dtype)
    wh = jnp.transpose(w_hh).astype(mxu_dtype)
    xs = x_tbi.astype(mxu_dtype)
    if reverse:
        xs = xs[::-1]

    def step(h, x_t):
        gi = jnp.dot(x_t, wi, preferred_element_type=jnp.float32) + b_ih
        gh = jnp.dot(h.astype(mxu_dtype), wh,
                     preferred_element_type=jnp.float32) + b_hh
        r = _sigmoid(gi[:, :H] + gh[:, :H])
        z = _sigmoid(gi[:, H:2 * H] + gh[:, H:2 * H])
        n = jnp.tanh(gi[:, 2 * H:] + r * gh[:, 2 * H:])
        h_new = (1.0 - z) * n + z * h
        return h_new, h_new

    h_last, ys = jax.lax.scan(step, h0.astype(jnp.float32), xs)
    if reverse:
        ys = ys[::-1]
    return ys.astype(x_tbi.dtype), h_last.astype(x_tbi.dtype)


# ---------------------------------------------------------------------------
# EncoderRNN.forward (time-major inside; one transpose in, one transpose out)
# ---------------------------------------------------------------------------
def _encoder_forward(inputs, params, gru_fn, ln_fn, *, nlayers, concat, bidir,
                     use_layernorm, return_last, mxu_dtype, block_t):
    B = inputs.shape[0]
    num_dir = 2 if bidir else 1
    x = jnp.transpose(inputs, (1, 0, 2))                      # (T, B, I)
    if use_layernorm:
        x = ln_fn(x, params["ln_gamma"], params["ln_beta"])

    outputs = []
    for i in range(nlayers):
        h_units = params["init_hidden"][i].shape[-1]
        h0 = jnp.broadcast_to(params["init_hidden"][i], (num_dir, B, h_units))
        dir_out, dir_h = [], []
        for d in range(num_dir):
            w_ih, w_hh, b_ih, b_hh = params["rnns"][i][d]
            o, h = gru_fn(x, h0[d], w_ih, w_hh, b_ih, b_hh, reverse=(d == 1),
                          mxu_dtype=mxu_dtype, block_t=block_t)
            dir_out.append(o)
            dir_h.append(h)
        x = jnp.concatenate(dir_out, axis=-1) if num_dir == 2 else dir_out[0]
        hidden = jnp.stack(dir_h, axis=0)                     # (num_dir, B, H)
        if return_last:
            outputs.append(jnp.transpose(hidden, (1, 0, 2)).reshape(B, -1))
        else:
            outputs.append(x)

    if return_last:
        return jnp.concatenate(outputs, axis=-1) if concat else outputs[-1]
    out = jnp.concatenate(outputs, axis=-1) if concat else outputs[-1]
    return jnp.transpose(out, (1, 0, 2))                      # back to (B, T, F)


def encoder_rnn_forward(inputs, params, *, mxu_dtype=jnp.bfloat16, block_t=32,
                        **cfg):
    return _encoder_forward(inputs, params, gru_layer, layer_norm,
                            mxu_dtype=mxu_dtype, block_t=block_t, **cfg)


def encoder_rnn_forward_ref(inputs, params, *, mxu_dtype=jnp.bfloat16,
                            block_t=32, **cfg):
    return _encoder_forward(inputs, params, _gru_layer_ref, _layer_norm_ref,
                            mxu_dtype=mxu_dtype, block_t=block_t, **cfg)


def init_encoder_params(key, *, input_size, num_units, nlayers, bidir,
                        use_layernorm):
    num_dir = 2 if bidir else 1
    params = {"rnns": [], "init_hidden": []}
    if use_layernorm:
        params["ln_gamma"] = jnp.ones((input_size,), jnp.float32)
        params["ln_beta"] = jnp.zeros((input_size,), jnp.float32)
    xavier = jax.nn.initializers.glorot_uniform()
    ortho = jax.nn.initializers.orthogonal()
    for i in range(nlayers):
        in_size = input_size if i == 0 else num_units * num_dir
        layer = []
        for _ in range(num_dir):
            key, k1, k2 = jax.random.split(key, 3)
            w_ih = xavier(k1, (3 * num_units, in_size), jnp.float32)
            w_hh = ortho(k2, (3 * num_units, num_units), jnp.float32)
            b_ih = jnp.zeros((3 * num_units,), jnp.float32)
            b_hh = jnp.zeros((3 * num_units,), jnp.float32)
            layer.append((w_ih, w_hh, b_ih, b_hh))
        params["rnns"].append(layer)
        params["init_hidden"].append(
            jnp.zeros((num_dir, 1, num_units), jnp.float32))
    return params


if __name__ == "__main__":
    # EncoderRNN constructor args
    input_size, num_units, nlayers = 32, 32, 2
    concat, bidir, layernorm, return_last = True, True, "layer", False
    use_layernorm = (layernorm == "layer")

    B, T = 2, 8
    key = jax.random.PRNGKey(0)
    kx, kp = jax.random.split(key)
    x = jax.random.normal(kx, (B, T, input_size), dtype=jnp.float32)
    params = init_encoder_params(kp, input_size=input_size,
                                 num_units=num_units, nlayers=nlayers,
                                 bidir=bidir, use_layernorm=use_layernorm)

    cfg = dict(nlayers=nlayers, concat=concat, bidir=bidir,
               use_layernorm=use_layernorm, return_last=return_last)
    expected_feat = num_units * (2 if bidir else 1) * (nlayers if concat else 1)

    # 1) f32 MXU path: must match the pure-f32 (PyTorch-equivalent) reference.
    out_f32 = jax.block_until_ready(
        encoder_rnn_forward(x, params, mxu_dtype=jnp.float32, **cfg))
    assert out_f32.shape == (B, T, expected_feat), out_f32.shape
    ref_f32 = jax.block_until_ready(
        encoder_rnn_forward_ref(x, params, mxu_dtype=jnp.float32, **cfg))
    err_f32 = float(jnp.max(jnp.abs(out_f32 - ref_f32)))
    assert jnp.allclose(out_f32, ref_f32, rtol=3e-3, atol=3e-3), err_f32

    # 2) bf16 MXU path (production default): compare against a reference that
    #    applies the same numeric policy (bf16 MXU operands, f32 accumulation
    #    and f32 hidden carry).
    out_bf16 = jax.block_until_ready(
        encoder_rnn_forward(x, params, mxu_dtype=jnp.bfloat16, **cfg))
    ref_bf16 = jax.block_until_ready(
        encoder_rnn_forward_ref(x, params, mxu_dtype=jnp.bfloat16, **cfg))
    err_bf16 = float(jnp.max(jnp.abs(out_bf16 - ref_bf16)))
    assert jnp.allclose(out_bf16, ref_bf16, rtol=2e-2, atol=2e-2), err_bf16
    # Informational only: bf16 policy vs pure-f32 semantics.
    _drift = float(jnp.max(jnp.abs(out_bf16 - ref_f32)))

    print("KERNEL_OK")
</pallas_src>

<mosaic_0001>
module attributes {stable_mosaic.version = 11 : i64} {
  func.func @_layernorm_kernel(%arg0: i32, %arg1: memref<16x32xf32, #tpu.memory_space<vmem>>, %arg2: memref<1x32xf32, #tpu.memory_space<vmem>>, %arg3: memref<1x32xf32, #tpu.memory_space<vmem>>, %arg4: memref<16x32xf32, #tpu.memory_space<vmem>>) attributes {dimension_semantics = [#tpu.dimension_semantics<parallel>], iteration_bounds = array<i64: 1>, scalar_prefetch = 0 : i64, scratch_operands = 0 : i64, tpu.core_type = #tpu.core_type<tc>, window_params = [{transform_indices = @transform_0, window_bounds = array<i64: 16, 32>}, {pipeline_mode = #tpu.pipeline_mode<synchronous>, transform_indices = @transform_1, window_bounds = array<i64: 1, 32>}, {pipeline_mode = #tpu.pipeline_mode<synchronous>, transform_indices = @transform_2, window_bounds = array<i64: 1, 32>}, {transform_indices = @transform_3, window_bounds = array<i64: 16, 32>}]} {
    %c0 = arith.constant 0 : index
    %c0_0 = arith.constant 0 : index
    %0 = vector.load %arg1[%c0, %c0_0] : memref<16x32xf32, #tpu.memory_space<vmem>>, vector<16x32xf32>
    %cst = arith.constant dense<0.000000e+00> : vector<16xf32>
    %1 = vector.multi_reduction <add>, %0, %cst [1] : vector<16x32xf32> to vector<16xf32>
    %2 = vector.shape_cast %1 : vector<16xf32> to vector<16x1xf32>
    %cst_1 = arith.constant 3.200000e+01 : f32
    %3 = vector.broadcast %cst_1 : f32 to vector<16x1xf32>
    %4 = arith.divf %2, %3 : vector<16x1xf32>
    %5 = vector.broadcast %4 : vector<16x1xf32> to vector<16x32xf32>
    %6 = arith.subf %0, %5 : vector<16x32xf32>
    %7 = arith.mulf %6, %6 : vector<16x32xf32>
    %cst_2 = arith.constant dense<0.000000e+00> : vector<16xf32>
    %8 = vector.multi_reduction <add>, %7, %cst_2 [1] : vector<16x32xf32> to vector<16xf32>
    %9 = vector.shape_cast %8 : vector<16xf32> to vector<16x1xf32>
    %cst_3 = arith.constant 3.200000e+01 : f32
    %10 = vector.broadcast %cst_3 : f32 to vector<16x1xf32>
    %11 = arith.divf %9, %10 : vector<16x1xf32>
    %cst_4 = arith.constant 9.99999974E-6 : f32
    %12 = vector.broadcast %cst_4 : f32 to vector<16x1xf32>
    %13 = arith.addf %11, %12 : vector<16x1xf32>
    %14 = math.rsqrt %13 : vector<16x1xf32>
    %15 = vector.broadcast %14 : vector<16x1xf32> to vector<16x32xf32>
    %16 = arith.mulf %6, %15 : vector<16x32xf32>
    %c0_5 = arith.constant 0 : index
    %c0_6 = arith.constant 0 : index
    %17 = vector.load %arg2[%c0_5, %c0_6] : memref<1x32xf32, #tpu.memory_space<vmem>>, vector<1x32xf32>
    %18 = vector.broadcast %17 : vector<1x32xf32> to vector<16x32xf32>
    %19 = arith.mulf %16, %18 : vector<16x32xf32>
    %c0_7 = arith.constant 0 : index
    %c0_8 = arith.constant 0 : index
    %20 = vector.load %arg3[%c0_7, %c0_8] : memref<1x32xf32, #tpu.memory_space<vmem>>, vector<1x32xf32>
    %21 = vector.broadcast %20 : vector<1x32xf32> to vector<16x32xf32>
    %22 = arith.addf %19, %21 : vector<16x32xf32>
    %c0_9 = arith.constant 0 : index
    %c0_10 = arith.constant 0 : index
    %23 = vector.load %arg4[%c0_9, %c0_10] : memref<16x32xf32, #tpu.memory_space<vmem>>, vector<16x32xf32>
    tpu.vector_store %arg4[%c0_9, %c0_10], %22 {strides = array<i32>} : memref<16x32xf32, #tpu.memory_space<vmem>>, vector<16x32xf32>,
    return
  }
  func.func @transform_0(%arg0: i32) -> (i32, i32) {
    %c0_i32 = arith.constant 0 : i32
    %c0_i32_0 = arith.constant 0 : i32
    return %arg0, %c0_i32 : i32, i32
  }
  func.func @transform_1(%arg0: i32) -> (i32, i32) {
    %c0_i32 = arith.constant 0 : i32
    %c0_i32_0 = arith.constant 0 : i32
    %c0_i32_1 = arith.constant 0 : i32
    return %c0_i32, %c0_i32_0 : i32, i32
  }
  func.func @transform_2(%arg0: i32) -> (i32, i32) {
    %c0_i32 = arith.constant 0 : i32
    %c0_i32_0 = arith.constant 0 : i32
    %c0_i32_1 = arith.constant 0 : i32
    return %c0_i32, %c0_i32_0 : i32, i32
  }
  func.func @transform_3(%arg0: i32) -> (i32, i32) {
    %c0_i32 = arith.constant 0 : i32
    %c0_i32_0 = arith.constant 0 : i32
    return %arg0, %c0_i32 : i32, i32
  }
}

</mosaic_0001>

<bundles_post_ra>
// kernel: tpu_custom_call.1
= control target key start
LH: loop header
LB: loop body
LE: loop exit
PB: predicated region body
PF: predicated region fallthrough
CT: control target
= control target key end

     0   :  { %8 = vsyncpa [#allocation3], 0  ;;  %s220_s0 = inlined_call_operand.hbm [shape: f32[16,32], index: 0, kind: input, shape index: {}]   ;;  %s221_s1 = inlined_call_operand.vmem [shape: f32[1,32], index: 1, kind: input, shape index: {}]   ;;  %s222_s2 = inlined_call_operand.vmem [shape: f32[1,32], index: 2, kind: input, shape index: {}]   ;;  %s223_s3 = inlined_call_operand.hbm [shape: f32[16,32], index: 3, kind: output, shape index: {}]  }
   0x1   :  { %9 = vsyncpa [#allocation4], 0  ;;  %s154_s12 = smov [#allocation2]   ;;  %s106_s16 = scalar_lea.hbm %s220_s0, 256 }
   0x2   :  { %s15_s13 = sshll.u32 %s154_s12, 4  ;;  %p107_p0 = scmp.ne.s32.totalorder %s220_s0, %s106_s16  ;;  %s16_s13 = int_to_ptr.vmem [resolvable:$true] %s15_s13 }
   0x3   :  { %p110_p1 = scmp.lt.u32.totalorder %s106_s16, %s220_s0 }
   0x5   :  { %p112_p2 = pnand %p110_p1, %p107_p0 }
   0x7   :  { %115 = shalt.err (!%p112_p2)
}
   0x8   :  { %s116_s21 = scalar_lea.vmem %s16_s13, 256  ;;  %p121_p4 = scmp.lt.s32.totalorder %s16_s13, %s16_s13 }
   0x9   :  { %p117_p3 = scmp.ne.s32.totalorder %s16_s13, %s116_s21  ;;  %p122_p5 = scmp.lt.s32.totalorder %s116_s21, %s116_s21 }
   0xb   :  { %p123_p6 = por %p122_p5, %p121_p4 }
   0xd   :  { %p124_p7 = pnand %p123_p6, %p117_p3 }
   0xf   :  { %127 = shalt.err (!%p124_p7)
}
  0x10   :  { %s155_s22 = smov 128   ;;  %s156_s23 = smov 8  }
  0x11   :  { %21 = dma.hbm_to_vmem [thread:$0]  %s220_s0, 256, %s16_s13, [#allocation3], %s155_s22, %s155_s22, %s156_s23  }
  0x12   :  { %150 = dma.done.wait [#allocation3], 256  }
  0x13   :  { %151 = vsyncadd [#allocation3], 4294967040  ;;  %vm31_vm0 = vcmask 261120   ;;  %v29_v0 = vld [vmem:[#allocation2] sm:$0xff]  ;;  %v30_v1 = vld [vmem:[#allocation2 + $0x8] sm:$0xff]  ;;  %s157_s29 = smov [#allocation5]  }
  0x14   :  { %v32_v2 = vsel %vm31_vm0, %v29_v0, 0.0  ;;  %v35_v3 = vsel %vm31_vm0, %v30_v1, 0.0  ;;  %v96_v21 = vld [vmem:[%s221_s1] ss:$0 sm:$0xff]  ;;  %s84_s30 = sshll.u32 %s157_s29, 4  ;;  %s85_s30 = int_to_ptr.vmem [resolvable:$true] %s84_s30 }
  0x15   :  { %33 = vadd.xlane.f32.xlu0 %v32_v2  ;;  %v97_v23 = vld [vmem:[%s222_s2] ss:$0 sm:$0xff]  ;;  %s128_s4 = scalar_lea.vmem %s85_s30, 256  ;;  %p133_p9 = scmp.lt.s32.totalorder %s85_s30, %s85_s30 }
  0x16   :  { %p129_p8 = scmp.ne.s32.totalorder %s85_s30, %s128_s4  ;;  %p134_p10 = scmp.lt.s32.totalorder %s128_s4, %s128_s4 }
  0x18   :  { %p135_p11 = por %p134_p10, %p133_p9 }
  0x19   :  { %36 = vadd.xlane.f32.xlu0 %v35_v3 }
  0x1a   :  { %p136_p12 = pnand %p135_p11, %p129_p8 }
  0xa2   :  { %v34_v4 = vpop.xlane.xlu0 %33 }
  0xa3   :  { %v39_v5 = vmul.f32 0.03125, %v34_v4 }
  0xa5   :  { %v41_v6 = vsub.f32 %v29_v0, %v39_v5 }
  0xa6   :  { %v37_v7 = vpop.xlane.xlu0 %36 }
  0xa7   :  { %v40_v8 = vmul.f32 0.03125, %v37_v7  ;;  %v43_v9 = vmul.f32 %v41_v6, %v41_v6 }
  0xa9   :  { %v42_v10 = vsub.f32 %v30_v1, %v40_v8  ;;  %v45_v11 = vsel %vm31_vm0, %v43_v9, 0.0 }
  0xaa   :  { %46 = vadd.xlane.f32.xlu1 %v45_v11 }
  0xab   :  { %v44_v12 = vmul.f32 %v42_v10, %v42_v10 }
  0xad   :  { %v48_v13 = vsel %vm31_vm0, %v44_v12, 0.0 }
  0xae   :  { %49 = vadd.xlane.f32.xlu1 %v48_v13 }
 0x137   :  { %v47_v14 = vpop.xlane.xlu1 %46 }
 0x138   :  { %v51_v15 = vmul.f32 0.03125, %v47_v14 }
 0x13a   :  { %v53_v16 = vadd.f32 1e-05, %v51_v15 }
 0x13b   :  { %v50_v17 = vpop.xlane.xlu1 %49 }
 0x13c   :  { %102 = vrsqrt.f32 %v53_v16  ;;  %v52_v18 = vmul.f32 0.03125, %v50_v17 }
 0x13e   :  { %v54_v19 = vadd.f32 1e-05, %v52_v18 }
 0x140   :  { %104 = vrsqrt.f32 %v54_v19 }
 0x146   :  { %v103_v20 = vpop.eup %102 }
 0x147   :  { %v57_v22 = vmul.f32 %v103_v20, %v41_v6 }
 0x149   :  { %v66_v24 = vmul.f32 %v96_v21, %v57_v22 }
 0x14a   :  { %v105_v25 = vpop.eup %104 }
 0x14b   :  { %v58_v26 = vmul.f32 %v105_v25, %v42_v10  ;;  %v75_v27 = vadd.f32 %v97_v23, %v66_v24 }
 0x14d   :  { %v67_v28 = vmul.f32 %v96_v21, %v58_v26  ;;  %77 = vst.msk [vmem:[#allocation5] sm:$0xff] %vm31_vm0, %v75_v27 }
 0x14f   :  { %v76_v29 = vadd.f32 %v97_v23, %v67_v28 }
 0x151   :  { %78 = vst.msk [vmem:[#allocation5 + $0x8] sm:$0xff] %vm31_vm0, %v76_v29 }
 0x152   :  { %139 = shalt.err (!%p136_p12)
}
 0x153   :  { %s140_s5 = scalar_lea.hbm %s223_s3, 256 }
 0x154   :  { %p141_p13 = scmp.ne.s32.totalorder %s223_s3, %s140_s5  ;;  %p144_p0 = scmp.lt.u32.totalorder %s140_s5, %s223_s3 }
 0x156   :  { %p146_p1 = pnand %p144_p0, %p141_p13 }
 0x158   :  { %149 = shalt.err (!%p146_p1)
}
 0x159   :  { %90 = dma.vmem_to_hbm [thread:$0]  %s85_s30, 256, %s223_s3, [#allocation4], %s155_s22, %s155_s22, %s156_s23  }
 0x15a   :  { %152 = dma.done.wait [#allocation4], 256  }
 0x15b   :  { %153 = vsyncadd [#allocation4], 4294967040 }
 0x15c   :  { %94 = vsyncpa [#allocation3], 1 }
 0x15d   :  { %95 = vsyncpa [#allocation4], 1 }

</bundles_post_ra>
